<compile_context>
chip_gen: v7x
topology: tpu7x:2x2x1
jax: 0.10.0
libtpu: 0.0.40
codegen_flags: <defaults>
</compile_context>

<pallas_src>
import functools

import jax
import jax.numpy as jnp
from jax.experimental import pallas as pl
from jax.experimental.pallas import tpu as pltpu

_LANE = 128
_MAX_TILE_ROWS = 2048   # 2048 x 128 f32 = 1 MiB per input block
_NUM_CHUNKS = 2         # parallel axis -> 2 TCs on v7x; harmless on 1-TC chips


def _wape_kernel(pred_ref, true_ref, num_out_ref, den_out_ref,
                 num_acc, den_acc, *, tile_rows, rows, tiles_per_chunk):
    c = pl.program_id(0)          # chunk (parallel axis)
    j = pl.program_id(1)          # row tile within chunk (arbitrary axis)

    @pl.when(j == 0)
    def _init():
        num_acc[...] = jnp.zeros_like(num_acc)
        den_acc[...] = jnp.zeros_like(den_acc)

    # Upcast in-register; HBM traffic stays at the native dtype width.
    pred = pred_ref[...].astype(jnp.float32)
    true = true_ref[...].astype(jnp.float32)
    abs_err = jnp.abs(pred - true)
    abs_true = jnp.abs(true)

    # Global (unclamped) row-tile index / first global row of this tile.
    g = c * tiles_per_chunk + j
    base_row = g * tile_rows

    @pl.when(base_row + tile_rows <= rows)
    def _full_tile():
        # Bulk path: pure elementwise VPU accumulate, no masking.
        num_acc[...] += abs_err
        den_acc[...] += abs_true

    @pl.when(base_row + tile_rows > rows)
    def _ragged_tile():
        # Last (or clamped/duplicated) tile: mask rows beyond the valid range.
        row_ids = base_row + jax.lax.broadcasted_iota(
            jnp.int32, (tile_rows, _LANE), 0)
        valid = row_ids < rows
        num_acc[...] += jnp.where(valid, abs_err, 0.0)
        den_acc[...] += jnp.where(valid, abs_true, 0.0)

    @pl.when(j == pl.num_programs(1) - 1)
    def _finalize():
        # Single cross-sublane reduction per chunk; the lane reduction and the
        # divide happen on the tiny partials in the JAX wrapper.
        num_out_ref[...] = jnp.sum(num_acc[...], axis=0, keepdims=True)[None]
        den_out_ref[...] = jnp.sum(den_acc[...], axis=0, keepdims=True)[None]


def wape(y_pred, y_true, eps=1e-9):
    assert y_pred.shape == y_true.shape
    n = int(y_pred.size)
    assert n > 0

    p = jnp.ravel(y_pred)
    t = jnp.ravel(y_true)

    # Minimal zero-pad to a lane multiple (<=127 elems; no-op for aligned N).
    # Zero padding contributes 0 to both partial sums.
    pad = (-n) % _LANE
    if pad:
        p = jnp.pad(p, (0, pad))
        t = jnp.pad(t, (0, pad))

    rows = (n + pad) // _LANE
    p2 = p.reshape(rows, _LANE)
    t2 = t.reshape(rows, _LANE)

    tile_rows = min(_MAX_TILE_ROWS, rows)   # _MAX_TILE_ROWS is a multiple of 8
    total_tiles = pl.cdiv(rows, tile_rows)
    num_chunks = _NUM_CHUNKS if total_tiles >= _NUM_CHUNKS else 1
    tiles_per_chunk = pl.cdiv(total_tiles, num_chunks)
    grid = (num_chunks, tiles_per_chunk)

    last_tile = total_tiles - 1

    def in_index_map(c, j):
        # Clamp so a duplicated trailing tile of the last chunk still maps to
        # a real block; its contribution is masked to zero inside the kernel.
        return (jnp.minimum(c * tiles_per_chunk + j, last_tile), 0)

    kernel = functools.partial(
        _wape_kernel,
        tile_rows=tile_rows, rows=rows, tiles_per_chunk=tiles_per_chunk)

    num_out, den_out = pl.pallas_call(
        kernel,
        out_shape=(
            jax.ShapeDtypeStruct((num_chunks, 1, _LANE), jnp.float32),
            jax.ShapeDtypeStruct((num_chunks, 1, _LANE), jnp.float32),
        ),
        grid_spec=pltpu.PrefetchScalarGridSpec(
            num_scalar_prefetch=0,
            grid=grid,
            in_specs=[
                pl.BlockSpec((tile_rows, _LANE), in_index_map),
                pl.BlockSpec((tile_rows, _LANE), in_index_map),
            ],
            out_specs=(
                pl.BlockSpec((1, 1, _LANE), lambda c, j: (c, 0, 0)),
                pl.BlockSpec((1, 1, _LANE), lambda c, j: (c, 0, 0)),
            ),
            scratch_shapes=[
                pltpu.VMEM((tile_rows, _LANE), jnp.float32),  # numerator acc
                pltpu.VMEM((tile_rows, _LANE), jnp.float32),  # denominator acc
            ],
        ),
        compiler_params=pltpu.CompilerParams(
            dimension_semantics=("parallel", "arbitrary"),
        ),
    )(p2, t2)

    # eps * N computed exactly on the host in double precision, added once.
    eps_n = jnp.float32(float(eps) * float(n))
    num = jnp.sum(num_out)
    den = jnp.sum(den_out) + eps_n
    return num / den


if __name__ == "__main__":
    key = jax.random.PRNGKey(0)
    k1, k2 = jax.random.split(key)

    # small shape consistent with an NCHW-style tensor
    shape = (2, 4, 16, 16)
    y_pred = jax.random.normal(k1, shape, dtype=jnp.float32)
    y_true = jax.random.normal(k2, shape, dtype=jnp.float32)

    result = jax.block_until_ready(wape(y_pred, y_true))

    # reference check in plain JAX (same semantics as the torch module)
    eps = 1e-9
    ref = jnp.sum(jnp.abs(y_pred - y_true)) / jnp.sum(eps + jnp.abs(y_true))
    assert jnp.allclose(result, ref, rtol=1e-5, atol=1e-6), (result, ref)

    print("KERNEL_OK")
</pallas_src>

<mosaic_0001>
module attributes {stable_mosaic.version = 11 : i64} {
  func.func @_wape_kernel(%arg0: i32, %arg1: i32, %arg2: memref<16x128xf32, #tpu.memory_space<vmem>>, %arg3: memref<16x128xf32, #tpu.memory_space<vmem>>, %arg4: memref<1x1x128xf32, #tpu.memory_space<vmem>>, %arg5: memref<1x1x128xf32, #tpu.memory_space<vmem>>, %arg6: memref<16x128xf32, #tpu.memory_space<vmem>>, %arg7: memref<16x128xf32, #tpu.memory_space<vmem>>) attributes {dimension_semantics = [#tpu.dimension_semantics<parallel>, #tpu.dimension_semantics<arbitrary>], iteration_bounds = array<i64: 1, 1>, scalar_prefetch = 0 : i64, scratch_operands = 2 : i64, tpu.core_type = #tpu.core_type<tc>, window_params = [{transform_indices = @transform_0, window_bounds = array<i64: 16, 128>}, {transform_indices = @transform_1, window_bounds = array<i64: 16, 128>}, {transform_indices = @transform_2, window_bounds = array<i64: 1, 1, 128>}, {transform_indices = @transform_3, window_bounds = array<i64: 1, 1, 128>}]} {
    %c0_i32 = arith.constant 0 : i32
    %0 = arith.cmpi eq, %arg1, %c0_i32 : i32
    %1 = arith.extui %0 : i1 to i32
    %c0_i32_0 = arith.constant 0 : i32
    %2 = arith.cmpi ne, %1, %c0_i32_0 : i32
    scf.if %2 {
      %cst = arith.constant 0.000000e+00 : f32
      %22 = vector.broadcast %cst : f32 to vector<16x128xf32>
      %c0_12 = arith.constant 0 : index
      %c0_13 = arith.constant 0 : index
      %23 = vector.load %arg6[%c0_12, %c0_13] : memref<16x128xf32, #tpu.memory_space<vmem>>, vector<16x128xf32>
      tpu.vector_store %arg6[%c0_12, %c0_13], %22 {strides = array<i32>} : memref<16x128xf32, #tpu.memory_space<vmem>>, vector<16x128xf32>,
      %cst_14 = arith.constant 0.000000e+00 : f32
      %24 = vector.broadcast %cst_14 : f32 to vector<16x128xf32>
      %c0_15 = arith.constant 0 : index
      %c0_16 = arith.constant 0 : index
      %25 = vector.load %arg7[%c0_15, %c0_16] : memref<16x128xf32, #tpu.memory_space<vmem>>, vector<16x128xf32>
      tpu.vector_store %arg7[%c0_15, %c0_16], %24 {strides = array<i32>} : memref<16x128xf32, #tpu.memory_space<vmem>>, vector<16x128xf32>,
    } else {
    }
    %c0 = arith.constant 0 : index
    %c0_1 = arith.constant 0 : index
    %3 = vector.load %arg2[%c0, %c0_1] : memref<16x128xf32, #tpu.memory_space<vmem>>, vector<16x128xf32>
    %c0_2 = arith.constant 0 : index
    %c0_3 = arith.constant 0 : index
    %4 = vector.load %arg3[%c0_2, %c0_3] : memref<16x128xf32, #tpu.memory_space<vmem>>, vector<16x128xf32>
    %5 = arith.subf %3, %4 : vector<16x128xf32>
    %6 = math.absf %5 : vector<16x128xf32>
    %7 = math.absf %4 : vector<16x128xf32>
    %c1_i32 = arith.constant 1 : i32
    %8 = arith.muli %arg0, %c1_i32 : i32
    %9 = arith.addi %8, %arg1 : i32
    %c16_i32 = arith.constant 16 : i32
    %10 = arith.muli %9, %c16_i32 : i32
    %c16_i32_4 = arith.constant 16 : i32
    %11 = arith.addi %10, %c16_i32_4 : i32
    %c16_i32_5 = arith.constant 16 : i32
    %12 = arith.cmpi sle, %11, %c16_i32_5 : i32
    %13 = arith.extui %12 : i1 to i32
    %c0_i32_6 = arith.constant 0 : i32
    %14 = arith.cmpi ne, %13, %c0_i32_6 : i32
    scf.if %14 {
      %c0_12 = arith.constant 0 : index
      %c0_13 = arith.constant 0 : index
      %22 = vector.load %arg6[%c0_12, %c0_13] : memref<16x128xf32, #tpu.memory_space<vmem>>, vector<16x128xf32>
      %23 = arith.addf %22, %6 : vector<16x128xf32>
      %c0_14 = arith.constant 0 : index
      %c0_15 = arith.constant 0 : index
      %24 = vector.load %arg6[%c0_14, %c0_15] : memref<16x128xf32, #tpu.memory_space<vmem>>, vector<16x128xf32>
      tpu.vector_store %arg6[%c0_14, %c0_15], %23 {strides = array<i32>} : memref<16x128xf32, #tpu.memory_space<vmem>>, vector<16x128xf32>,
      %c0_16 = arith.constant 0 : index
      %c0_17 = arith.constant 0 : index
      %25 = vector.load %arg7[%c0_16, %c0_17] : memref<16x128xf32, #tpu.memory_space<vmem>>, vector<16x128xf32>
      %26 = arith.addf %25, %7 : vector<16x128xf32>
      %c0_18 = arith.constant 0 : index
      %c0_19 = arith.constant 0 : index
      %27 = vector.load %arg7[%c0_18, %c0_19] : memref<16x128xf32, #tpu.memory_space<vmem>>, vector<16x128xf32>
      tpu.vector_store %arg7[%c0_18, %c0_19], %26 {strides = array<i32>} : memref<16x128xf32, #tpu.memory_space<vmem>>, vector<16x128xf32>,
    } else {
    }
    %c16_i32_7 = arith.constant 16 : i32
    %15 = arith.addi %10, %c16_i32_7 : i32
    %c16_i32_8 = arith.constant 16 : i32
    %16 = arith.cmpi sgt, %15, %c16_i32_8 : i32
    %17 = arith.extui %16 : i1 to i32
    %c0_i32_9 = arith.constant 0 : i32
    %18 = arith.cmpi ne, %17, %c0_i32_9 : i32
    scf.if %18 {
      %22 = tpu.iota {dimensions = array<i32: 0>} : vector<16x128xi32>
      %23 = vector.broadcast %10 : i32 to vector<16x128xi32>
      %24 = arith.addi %23, %22 : vector<16x128xi32>
      %c16_i32_12 = arith.constant 16 : i32
      %25 = vector.broadcast %c16_i32_12 : i32 to vector<16x128xi32>
      %26 = arith.cmpi slt, %24, %25 : vector<16x128xi32>
      %c0_13 = arith.constant 0 : index
      %c0_14 = arith.constant 0 : index
      %27 = vector.load %arg6[%c0_13, %c0_14] : memref<16x128xf32, #tpu.memory_space<vmem>>, vector<16x128xf32>
      %cst = arith.constant 0.000000e+00 : f32
      %28 = vector.broadcast %cst : f32 to vector<16x128xf32>
      %29 = arith.select %26, %6, %28 : vector<16x128xi1>, vector<16x128xf32>
      %30 = arith.addf %27, %29 : vector<16x128xf32>
      %c0_15 = arith.constant 0 : index
      %c0_16 = arith.constant 0 : index
      %31 = vector.load %arg6[%c0_15, %c0_16] : memref<16x128xf32, #tpu.memory_space<vmem>>, vector<16x128xf32>
      tpu.vector_store %arg6[%c0_15, %c0_16], %30 {strides = array<i32>} : memref<16x128xf32, #tpu.memory_space<vmem>>, vector<16x128xf32>,
      %c0_17 = arith.constant 0 : index
      %c0_18 = arith.constant 0 : index
      %32 = vector.load %arg7[%c0_17, %c0_18] : memref<16x128xf32, #tpu.memory_space<vmem>>, vector<16x128xf32>
      %cst_19 = arith.constant 0.000000e+00 : f32
      %33 = vector.broadcast %cst_19 : f32 to vector<16x128xf32>
      %34 = arith.select %26, %7, %33 : vector<16x128xi1>, vector<16x128xf32>
      %35 = arith.addf %32, %34 : vector<16x128xf32>
      %c0_20 = arith.constant 0 : index
      %c0_21 = arith.constant 0 : index
      %36 = vector.load %arg7[%c0_20, %c0_21] : memref<16x128xf32, #tpu.memory_space<vmem>>, vector<16x128xf32>
      tpu.vector_store %arg7[%c0_20, %c0_21], %35 {strides = array<i32>} : memref<16x128xf32, #tpu.memory_space<vmem>>, vector<16x128xf32>,
    } else {
    }
    %c0_i32_10 = arith.constant 0 : i32
    %19 = arith.cmpi eq, %arg1, %c0_i32_10 : i32
    %20 = arith.extui %19 : i1 to i32
    %c0_i32_11 = arith.constant 0 : i32
    %21 = arith.cmpi ne, %20, %c0_i32_11 : i32
    scf.if %21 {
      %c0_12 = arith.constant 0 : index
      %c0_13 = arith.constant 0 : index
      %22 = vector.load %arg6[%c0_12, %c0_13] : memref<16x128xf32, #tpu.memory_space<vmem>>, vector<16x128xf32>
      %cst = arith.constant dense<0.000000e+00> : vector<128xf32>
      %23 = vector.multi_reduction <add>, %22, %cst [0] : vector<16x128xf32> to vector<128xf32>
      %24 = vector.shape_cast %23 : vector<128xf32> to vector<1x128xf32>
      %25 = vector.shape_cast %24 : vector<1x128xf32> to vector<1x1x128xf32>
      %c0_14 = arith.constant 0 : index
      %c0_15 = arith.constant 0 : index
      %c0_16 = arith.constant 0 : index
      %26 = vector.load %arg4[%c0_14, %c0_15, %c0_16] : memref<1x1x128xf32, #tpu.memory_space<vmem>>, vector<1x1x128xf32>
      tpu.vector_store %arg4[%c0_14, %c0_15, %c0_16], %25 {strides = array<i32>} : memref<1x1x128xf32, #tpu.memory_space<vmem>>, vector<1x1x128xf32>,
      %c0_17 = arith.constant 0 : index
      %c0_18 = arith.constant 0 : index
      %27 = vector.load %arg7[%c0_17, %c0_18] : memref<16x128xf32, #tpu.memory_space<vmem>>, vector<16x128xf32>
      %cst_19 = arith.constant dense<0.000000e+00> : vector<128xf32>
      %28 = vector.multi_reduction <add>, %27, %cst_19 [0] : vector<16x128xf32> to vector<128xf32>
      %29 = vector.shape_cast %28 : vector<128xf32> to vector<1x128xf32>
      %30 = vector.shape_cast %29 : vector<1x128xf32> to vector<1x1x128xf32>
      %c0_20 = arith.constant 0 : index
      %c0_21 = arith.constant 0 : index
      %c0_22 = arith.constant 0 : index
      %31 = vector.load %arg5[%c0_20, %c0_21, %c0_22] : memref<1x1x128xf32, #tpu.memory_space<vmem>>, vector<1x1x128xf32>
      tpu.vector_store %arg5[%c0_20, %c0_21, %c0_22], %30 {strides = array<i32>} : memref<1x1x128xf32, #tpu.memory_space<vmem>>, vector<1x1x128xf32>,
    } else {
    }
    return
  }
  func.func @transform_0(%arg0: i32, %arg1: i32) -> (i32, i32) {
    %c1_i32 = arith.constant 1 : i32
    %0 = arith.muli %arg0, %c1_i32 : i32
    %1 = arith.addi %0, %arg1 : i32
    %c0_i32 = arith.constant 0 : i32
    %2 = arith.minsi %1, %c0_i32 : i32
    %c0_i32_0 = arith.constant 0 : i32
    %c0_i32_1 = arith.constant 0 : i32
    return %2, %c0_i32_0 : i32, i32
  }
  func.func @transform_1(%arg0: i32, %arg1: i32) -> (i32, i32) {
    %c1_i32 = arith.constant 1 : i32
    %0 = arith.muli %arg0, %c1_i32 : i32
    %1 = arith.addi %0, %arg1 : i32
    %c0_i32 = arith.constant 0 : i32
    %2 = arith.minsi %1, %c0_i32 : i32
    %c0_i32_0 = arith.constant 0 : i32
    %c0_i32_1 = arith.constant 0 : i32
    return %2, %c0_i32_0 : i32, i32
  }
  func.func @transform_2(%arg0: i32, %arg1: i32) -> (i32, i32, i32) {
    %c0_i32 = arith.constant 0 : i32
    %c0_i32_0 = arith.constant 0 : i32
    %c0_i32_1 = arith.constant 0 : i32
    return %arg0, %c0_i32, %c0_i32_0 : i32, i32, i32
  }
  func.func @transform_3(%arg0: i32, %arg1: i32) -> (i32, i32, i32) {
    %c0_i32 = arith.constant 0 : i32
    %c0_i32_0 = arith.constant 0 : i32
    %c0_i32_1 = arith.constant 0 : i32
    return %arg0, %c0_i32, %c0_i32_0 : i32, i32, i32
  }
}

</mosaic_0001>

<bundles_post_ra>
// kernel: tpu_custom_call.1
= control target key start
LH: loop header
LB: loop body
LE: loop exit
PB: predicated region body
PF: predicated region fallthrough
CT: control target
= control target key end

     0   :  { %9 = vsyncpa [#allocation5], 0  ;;  %s369_s0 = inlined_call_operand.hbm [shape: f32[16,128], index: 0, kind: input, shape index: {}]   ;;  %s370_s1 = inlined_call_operand.hbm [shape: f32[16,128], index: 1, kind: input, shape index: {}]   ;;  %s371_s2 = inlined_call_operand.hbm [shape: f32[1,1,128], index: 2, kind: output, shape index: {0}]   ;;  %s372_s3 = inlined_call_operand.hbm [shape: f32[1,1,128], index: 3, kind: output, shape index: {1}]  }
   0x1   :  { %10 = vsyncpa [#allocation8], 0 }
   0x2   :  { %11 = vsyncpa [#allocation6], 0 }
   0x3   :  { %12 = vsyncpa [#allocation11], 0  ;;  %s287_s12 = smov [#allocation4]   ;;  %s191_s16 = scalar_lea.hbm %s369_s0, 256 }
   0x4   :  { %s24_s13 = sshll.u32 %s287_s12, 4  ;;  %p192_p0 = scmp.ne.s32.totalorder %s369_s0, %s191_s16  ;;  %s25_s13 = int_to_ptr.vmem [resolvable:$true] %s24_s13 }
   0x5   :  { %p195_p1 = scmp.lt.u32.totalorder %s191_s16, %s369_s0 }
   0x7   :  { %p197_p2 = pnand %p195_p1, %p192_p0 }
   0x9   :  { %200 = shalt.err (!%p197_p2)
}
   0xa   :  { %s201_s21 = scalar_lea.vmem %s25_s13, 256  ;;  %p206_p4 = scmp.lt.s32.totalorder %s25_s13, %s25_s13 }
   0xb   :  { %p202_p3 = scmp.ne.s32.totalorder %s25_s13, %s201_s21  ;;  %p207_p5 = scmp.lt.s32.totalorder %s201_s21, %s201_s21 }
   0xd   :  { %p208_p6 = por %p207_p5, %p206_p4 }
   0xf   :  { %p209_p7 = pnand %p208_p6, %p202_p3 }
  0x11   :  { %212 = shalt.err (!%p209_p7)
}
  0x12   :  { %s288_s22 = smov 128   ;;  %s289_s23 = smov 8  }
  0x13   :  { %30 = dma.hbm_to_vmem [thread:$0]  %s369_s0, 256, %s25_s13, [#allocation5], %s288_s22, %s288_s22, %s289_s23  }
  0x14   :  { %s290_s26 = smov [#allocation7]   ;;  %s213_s30 = scalar_lea.hbm %s370_s1, 256 }
  0x15   :  { %s42_s27 = sshll.u32 %s290_s26, 4  ;;  %p214_p8 = scmp.ne.s32.totalorder %s370_s1, %s213_s30  ;;  %s43_s27 = int_to_ptr.vmem [resolvable:$true] %s42_s27 }
  0x16   :  { %p217_p9 = scmp.lt.u32.totalorder %s213_s30, %s370_s1 }
  0x18   :  { %p219_p10 = pnand %p217_p9, %p214_p8 }
  0x1a   :  { %222 = shalt.err (!%p219_p10)
}
  0x1b   :  { %s223_s8 = scalar_lea.vmem %s43_s27, 256  ;;  %p228_p12 = scmp.lt.s32.totalorder %s43_s27, %s43_s27 }
  0x1c   :  { %p224_p11 = scmp.ne.s32.totalorder %s43_s27, %s223_s8  ;;  %p229_p13 = scmp.lt.s32.totalorder %s223_s8, %s223_s8 }
  0x1e   :  { %p230_p0 = por %p229_p13, %p228_p12 }
  0x20   :  { %p231_p1 = pnand %p230_p0, %p224_p11 }
  0x22   :  { %234 = shalt.err (!%p231_p1)
}
  0x23   :  { %48 = dma.hbm_to_vmem [thread:$0]  %s370_s1, 256, %s43_s27, [#allocation8], %s288_s22, %s288_s22, %s289_s23  }
  0x24   :  { %279 = dma.done.wait [#allocation5], 256  }
  0x25   :  { %280 = vsyncadd [#allocation5], 4294967040 }
  0x26   :  { %281 = dma.done.wait [#allocation8], 256  }
  0x27   :  { %282 = vsyncadd [#allocation8], 4294967040  ;;  %v71_v0 = vld [vmem:[#allocation4] sm:$0xff]  ;;  %v72_v1 = vld [vmem:[#allocation4 + $0x8] sm:$0xff]  ;;  %s291_s1 = smov [#allocation10]   ;;  %s292_s11 = smov [#allocation9]  }
  0x28   :  { %v73_v2 = vld [vmem:[#allocation7] sm:$0xff]  ;;  %v74_v3 = vld [vmem:[#allocation7 + $0x8] sm:$0xff]  ;;  %s167_s10 = sshll.u32 %s291_s1, 4  ;;  %s157_s12 = sshll.u32 %s292_s11, 4  ;;  %s168_s10 = int_to_ptr.vmem [resolvable:$true] %s167_s10  ;;  %s337_s12 = int_to_ptr.vmem [resolvable:$true] %s157_s12 }
  0x29   :  { %v75_v4 = vsub.f32 %v71_v0, %v73_v2  ;;  %v79_v5 = vand.u32 2147483647, %v73_v2  ;;  %v76_v6 = vsub.f32 %v72_v1, %v74_v3  ;;  %v80_v7 = vand.u32 2147483647, %v74_v3  ;;  %s235_s13 = scalar_lea.vmem %s168_s10, 16  ;;  %s239_s14 = scalar_lea.vmem %s168_s10, 32 }
  0x2a   :  { %p236_p2 = scmp.ne.s32.totalorder %s168_s10, %s235_s13  ;;  %p240_p3 = scmp.lt.s32.totalorder %s168_s10, %s168_s10 }
  0x2b   :  { %v77_v8 = vand.u32 2147483647, %v75_v4  ;;  %v78_v9 = vand.u32 2147483647, %v76_v6  ;;  %v143_v10 = vadd.f32 %v80_v7, %v79_v5  ;;  %p241_p4 = scmp.lt.s32.totalorder %s239_s14, %s235_s13 }
  0x2d   :  { %v133_v11 = vadd.f32 %v78_v9, %v77_v8  ;;  %v144_v12 = vrot.slane %v143_v10, 4  ;;  %p242_p5 = por %p241_p4, %p240_p3 }
  0x2f   :  { %v134_v13 = vrot.slane %v133_v11, 4  ;;  %v145_v14 = vadd.f32 %v144_v12, %v143_v10  ;;  %p243_p6 = pnand %p242_p5, %p236_p2 }
  0x31   :  { %v135_v15 = vadd.f32 %v134_v13, %v133_v11  ;;  %v146_v16 = vrot.slane %v145_v14, 2 }
  0x33   :  { %v136_v17 = vrot.slane %v135_v15, 2  ;;  %v147_v18 = vadd.f32 %v146_v16, %v145_v14 }
  0x35   :  { %v137_v19 = vadd.f32 %v136_v17, %v135_v15  ;;  %v148_v20 = vrot.slane %v147_v18, 1 }
  0x37   :  { %v138_v21 = vrot.slane %v137_v19, 1  ;;  %v149_v22 = vadd.f32 %v148_v20, %v147_v18 }
  0x39   :  { %v139_v23 = vadd.f32 %v138_v21, %v137_v19  ;;  %150 = vst [vmem:[#allocation10] sm:$0x1] %v149_v22 }
  0x3a   :  { %246 = shalt.err (!%p243_p6)
}
  0x3b   :  { %s247_s17 = scalar_lea.hbm %s372_s3, 16 }
  0x3c   :  { %p248_p7 = scmp.ne.s32.totalorder %s372_s3, %s247_s17  ;;  %p251_p8 = scmp.lt.u32.totalorder %s247_s17, %s372_s3 }
  0x3e   :  { %p253_p9 = pnand %p251_p8, %p248_p7 }
  0x40   :  { %256 = shalt.err (!%p253_p9)
}
  0x41   :  { %170 = dma.vmem_to_hbm [thread:$0]  %s168_s10, 16, %s372_s3, [#allocation11]   ;;  %140 = vst [vmem:[#allocation9] sm:$0x1] %v139_v23 }
  0x42   :  { %s257_s24 = scalar_lea.vmem %s337_s12, 16  ;;  %s261_s25 = scalar_lea.vmem %s337_s12, 32 }
  0x43   :  { %p258_p10 = scmp.ne.s32.totalorder %s337_s12, %s257_s24  ;;  %p262_p11 = scmp.lt.s32.totalorder %s337_s12, %s337_s12 }
  0x44   :  { %p263_p12 = scmp.lt.s32.totalorder %s261_s25, %s257_s24 }
  0x46   :  { %p264_p13 = por %p263_p12, %p262_p11 }
  0x48   :  { %p265_p0 = pnand %p264_p13, %p258_p10 }
  0x4a   :  { %268 = shalt.err (!%p265_p0)
}
  0x4b   :  { %s269_s28 = scalar_lea.hbm %s371_s2, 16 }
  0x4c   :  { %p270_p1 = scmp.ne.s32.totalorder %s371_s2, %s269_s28  ;;  %p273_p2 = scmp.lt.u32.totalorder %s269_s28, %s371_s2 }
  0x4e   :  { %p275_p3 = pnand %p273_p2, %p270_p1 }
  0x50   :  { %278 = shalt.err (!%p275_p3)
}
  0x51   :  { %160 = dma.vmem_to_hbm [thread:$0]  %s337_s12, 16, %s371_s2, [#allocation6]  }
  0x52   :  { %283 = dma.done.wait [#allocation6], 16  }
  0x53   :  { %284 = vsyncadd [#allocation6], 4294967280 }
  0x54   :  { %285 = dma.done.wait [#allocation11], 16  }
  0x55   :  { %286 = vsyncadd [#allocation11], 4294967280 }
  0x56   :  { %177 = vsyncpa [#allocation5], 1 }
  0x57   :  { %178 = vsyncpa [#allocation8], 1 }
  0x58   :  { %179 = vsyncpa [#allocation6], 1 }
  0x59   :  { %180 = vsyncpa [#allocation11], 1 }

</bundles_post_ra>
